<compile_context>
chip_gen: v7x
topology: tpu7x:2x2x1
jax: 0.10.0
libtpu: 0.0.40
codegen_flags: <defaults>
</compile_context>

<pallas_src>
import functools
import math

import jax
import jax.numpy as jnp
from jax import lax
from jax.experimental import pallas as pl
from jax.experimental.pallas import tpu as pltpu


def _center_intersection_kernel(x_ref, w1_ref, b1_ref, w2_ref, b2_ref, out_ref,
                                *, matmul_dtype, approx_recip):
    # x: (N, B_TILE, D) f32; w1, w2: (D, D) in (out, in) layout; b1, b2: (1, D)
    n, bt, d = x_ref.shape
    x = x_ref[...]
    x2 = x.reshape(n * bt, d)            # layout-free merge (bt is a multiple of 8)

    xm = x2.astype(matmul_dtype)
    w1 = w1_ref[...].astype(matmul_dtype)
    w2 = w2_ref[...].astype(matmul_dtype)

    # y = x @ W.T, consuming the PyTorch (out, in) weight layout directly on the
    # MXU (contract dim 1 of x with dim 1 of W) -> no materialized transpose.
    dn = (((1,), (1,)), ((), ()))
    h = lax.dot_general(xm, w1, dn, preferred_element_type=jnp.float32) + b1_ref[...]
    h = jnp.maximum(h, 0.0)
    logits = lax.dot_general(h.astype(matmul_dtype), w2, dn,
                             preferred_element_type=jnp.float32) + b2_ref[...]

    # softmax over the conjunct axis (N), per query, per feature (== dim=0 in torch).
    lg = logits.reshape(n, bt, d)        # layout-free split back into groups
    m = jnp.max(lg, axis=0, keepdims=True)
    e = jnp.exp(lg - m)
    inv = pl.reciprocal(jnp.sum(e, axis=0, keepdims=True), approx=approx_recip)
    att = e * inv

    # attention-weighted sum of the original embeddings over the conjunct axis.
    out_ref[...] = jnp.sum(att * x, axis=0).astype(out_ref.dtype)


def _round_up(x, m):
    return (x + m - 1) // m * m


def center_intersection(embeddings, w1, b1, w2, b2, *, block_b=32,
                        matmul_dtype=jnp.float32, approx_recip=False):
    """GQE CenterIntersection forward.

    embeddings: (N, B, D) or (N, D) float32
    w1, w2:     (D, D) nn.Linear weights in PyTorch (out, in) layout
    b1, b2:     (D,)
    returns:    (B, D) or (D,)

    block_b: queries per grid step (multiple of 8). For large B, raise it so
    N * block_b approaches 128 (v5e) / 256 (v6e, v7x) MXU rows.
    """
    squeeze = embeddings.ndim == 2
    if squeeze:
        embeddings = embeddings[:, None, :]
    n, b, d = embeddings.shape
    assert block_b % 8 == 0, "block_b must be a multiple of 8 sublanes"

    bb = min(block_b, _round_up(b, 8))
    b_pad = _round_up(b, bb)
    if b_pad != b:
        embeddings = jnp.pad(embeddings, ((0, 0), (0, b_pad - b), (0, 0)))

    kernel = functools.partial(_center_intersection_kernel,
                               matmul_dtype=matmul_dtype,
                               approx_recip=approx_recip)

    out = pl.pallas_call(
        kernel,
        out_shape=jax.ShapeDtypeStruct((b_pad, d), embeddings.dtype),
        grid=(pl.cdiv(b_pad, bb),),
        in_specs=[
            pl.BlockSpec((n, bb, d), lambda i: (0, i, 0)),   # x tile streams per step
            pl.BlockSpec((d, d), lambda i: (0, 0)),          # w1 resident in VMEM
            pl.BlockSpec((1, d), lambda i: (0, 0)),          # b1 resident
            pl.BlockSpec((d, d), lambda i: (0, 0)),          # w2 resident
            pl.BlockSpec((1, d), lambda i: (0, 0)),          # b2 resident
        ],
        out_specs=pl.BlockSpec((bb, d), lambda i: (i, 0)),
        compiler_params=pltpu.CompilerParams(
            dimension_semantics=("parallel",),               # shards across v7x's 2 TCs
        ),
    )(embeddings, w1, b1.reshape(1, d), w2, b2.reshape(1, d))

    out = out[:b]
    return out[0] if squeeze else out


def reference(embeddings, w1, b1, w2, b2):
    h = jax.nn.relu(embeddings @ w1.T + b1)
    att = jax.nn.softmax(h @ w2.T + b2, axis=0)
    return jnp.sum(att * embeddings, axis=0)


def xavier_uniform(key, shape, dtype=jnp.float32):
    fan_in, fan_out = shape[1], shape[0]
    bound = math.sqrt(6.0 / (fan_in + fan_out))
    return jax.random.uniform(key, shape, dtype, minval=-bound, maxval=bound)


# TODO(synk): DistMult's query-type dispatch and entity/relation embedding gathers
# (Python-list indexing) remain in host JAX/XLA; only the center_net is kernelized.

if __name__ == "__main__":
    DIM = 128      # embed_dim
    N_CONJ = 3     # e.g. '3i' queries: 3 stacked subquery embeddings
    BATCH = 64     # independent intersections per pallas_call

    key = jax.random.PRNGKey(0)
    k_x, k_w1, k_b1, k_w2, k_b2 = jax.random.split(key, 5)

    embeddings = jax.random.normal(k_x, (N_CONJ, BATCH, DIM), jnp.float32)

    # nn.Linear params: weight (out, in) xavier-uniform, bias uniform(+-1/sqrt(fan_in))
    w1 = xavier_uniform(k_w1, (DIM, DIM))
    w2 = xavier_uniform(k_w2, (DIM, DIM))
    bound = 1.0 / math.sqrt(DIM)
    b1 = jax.random.uniform(k_b1, (DIM,), jnp.float32, minval=-bound, maxval=bound)
    b2 = jax.random.uniform(k_b2, (DIM,), jnp.float32, minval=-bound, maxval=bound)

    ref = reference(embeddings, w1, b1, w2, b2)

    # f32 path: exact semantics of the PyTorch module.
    out = center_intersection(embeddings, w1, b1, w2, b2,
                              block_b=32, matmul_dtype=jnp.float32,
                              approx_recip=False)
    out = jax.block_until_ready(out)
    assert out.shape == (BATCH, DIM)
    assert jnp.allclose(out, ref, atol=1e-5, rtol=1e-5), "f32 mismatch vs reference"

    # bf16-MXU-operand / f32-accumulate fast path (v6e/v7x); elementwise stays f32.
    out_bf16 = center_intersection(embeddings, w1, b1, w2, b2,
                                   block_b=32, matmul_dtype=jnp.bfloat16,
                                   approx_recip=True)
    out_bf16 = jax.block_until_ready(out_bf16)
    assert jnp.allclose(out_bf16, ref, atol=5e-2, rtol=5e-2), "bf16 mismatch vs reference"

    # original single-intersection (N, D) usage still works.
    single = center_intersection(embeddings[:, 0, :], w1, b1, w2, b2)
    single = jax.block_until_ready(single)
    assert single.shape == (DIM,)
    assert jnp.allclose(single, ref[0], atol=1e-5, rtol=1e-5), "single mismatch"

    print("KERNEL_OK")
</pallas_src>

<mosaic_0001>
module attributes {stable_mosaic.version = 11 : i64} {
  func.func @_center_intersection_kernel(%arg0: i32, %arg1: memref<3x32x128xf32, #tpu.memory_space<vmem>>, %arg2: memref<128x128xf32, #tpu.memory_space<vmem>>, %arg3: memref<1x128xf32, #tpu.memory_space<vmem>>, %arg4: memref<128x128xf32, #tpu.memory_space<vmem>>, %arg5: memref<1x128xf32, #tpu.memory_space<vmem>>, %arg6: memref<32x128xf32, #tpu.memory_space<vmem>>) attributes {dimension_semantics = [#tpu.dimension_semantics<parallel>], iteration_bounds = array<i64: 2>, scalar_prefetch = 0 : i64, scratch_operands = 0 : i64, tpu.core_type = #tpu.core_type<tc>, window_params = [{transform_indices = @transform_0, window_bounds = array<i64: 3, 32, 128>}, {pipeline_mode = #tpu.pipeline_mode<synchronous>, transform_indices = @transform_1, window_bounds = array<i64: 128, 128>}, {pipeline_mode = #tpu.pipeline_mode<synchronous>, transform_indices = @transform_2, window_bounds = array<i64: 1, 128>}, {pipeline_mode = #tpu.pipeline_mode<synchronous>, transform_indices = @transform_3, window_bounds = array<i64: 128, 128>}, {pipeline_mode = #tpu.pipeline_mode<synchronous>, transform_indices = @transform_4, window_bounds = array<i64: 1, 128>}, {transform_indices = @transform_5, window_bounds = array<i64: 32, 128>}]} {
    %c0 = arith.constant 0 : index
    %c0_0 = arith.constant 0 : index
    %c0_1 = arith.constant 0 : index
    %0 = vector.load %arg1[%c0, %c0_0, %c0_1] : memref<3x32x128xf32, #tpu.memory_space<vmem>>, vector<3x32x128xf32>
    %1 = vector.shape_cast %0 : vector<3x32x128xf32> to vector<96x128xf32>
    %c0_2 = arith.constant 0 : index
    %c0_3 = arith.constant 0 : index
    %2 = vector.load %arg2[%c0_2, %c0_3] : memref<128x128xf32, #tpu.memory_space<vmem>>, vector<128x128xf32>
    %c0_4 = arith.constant 0 : index
    %c0_5 = arith.constant 0 : index
    %3 = vector.load %arg4[%c0_4, %c0_5] : memref<128x128xf32, #tpu.memory_space<vmem>>, vector<128x128xf32>
    %cst = arith.constant dense<0.000000e+00> : vector<96x128xf32>
    %4 = tpu.matmul %1, %2, %cst {dimension_numbers = #tpu.dot_dimension_numbers<[1], [1], [0], [0], [0, 0, 1, 0], [], []>} : vector<96x128xf32>, vector<128x128xf32>, vector<96x128xf32> -> vector<96x128xf32>
    %c0_6 = arith.constant 0 : index
    %c0_7 = arith.constant 0 : index
    %5 = vector.load %arg3[%c0_6, %c0_7] : memref<1x128xf32, #tpu.memory_space<vmem>>, vector<1x128xf32>
    %6 = vector.broadcast %5 : vector<1x128xf32> to vector<96x128xf32>
    %7 = arith.addf %4, %6 : vector<96x128xf32>
    %cst_8 = arith.constant 0.000000e+00 : f32
    %8 = vector.broadcast %cst_8 : f32 to vector<96x128xf32>
    %9 = arith.maximumf %7, %8 : vector<96x128xf32>
    %cst_9 = arith.constant dense<0.000000e+00> : vector<96x128xf32>
    %10 = tpu.matmul %9, %3, %cst_9 {dimension_numbers = #tpu.dot_dimension_numbers<[1], [1], [0], [0], [0, 0, 1, 0], [], []>} : vector<96x128xf32>, vector<128x128xf32>, vector<96x128xf32> -> vector<96x128xf32>
    %c0_10 = arith.constant 0 : index
    %c0_11 = arith.constant 0 : index
    %11 = vector.load %arg5[%c0_10, %c0_11] : memref<1x128xf32, #tpu.memory_space<vmem>>, vector<1x128xf32>
    %12 = vector.broadcast %11 : vector<1x128xf32> to vector<96x128xf32>
    %13 = arith.addf %10, %12 : vector<96x128xf32>
    %14 = vector.shape_cast %13 : vector<96x128xf32> to vector<3x32x128xf32>
    %cst_12 = arith.constant dense<0xFF800000> : vector<32x128xf32>
    %15 = vector.multi_reduction <maximumf>, %14, %cst_12 [0] : vector<3x32x128xf32> to vector<32x128xf32>
    %16 = vector.shape_cast %15 : vector<32x128xf32> to vector<1x32x128xf32>
    %17 = vector.broadcast %16 : vector<1x32x128xf32> to vector<3x32x128xf32>
    %18 = arith.subf %14, %17 : vector<3x32x128xf32>
    %19 = math.exp %18 : vector<3x32x128xf32>
    %cst_13 = arith.constant dense<0.000000e+00> : vector<32x128xf32>
    %20 = vector.multi_reduction <add>, %19, %cst_13 [0] : vector<3x32x128xf32> to vector<32x128xf32>
    %21 = vector.shape_cast %20 : vector<32x128xf32> to vector<1x32x128xf32>
    %22 = tpu.reciprocal %21 : vector<1x32x128xf32> -> vector<1x32x128xf32>
    %23 = vector.broadcast %22 : vector<1x32x128xf32> to vector<3x32x128xf32>
    %24 = arith.mulf %19, %23 : vector<3x32x128xf32>
    %25 = arith.mulf %24, %0 : vector<3x32x128xf32>
    %cst_14 = arith.constant dense<0.000000e+00> : vector<32x128xf32>
    %26 = vector.multi_reduction <add>, %25, %cst_14 [0] : vector<3x32x128xf32> to vector<32x128xf32>
    %c0_15 = arith.constant 0 : index
    %c0_16 = arith.constant 0 : index
    %27 = vector.load %arg6[%c0_15, %c0_16] : memref<32x128xf32, #tpu.memory_space<vmem>>, vector<32x128xf32>
    tpu.vector_store %arg6[%c0_15, %c0_16], %26 {strides = array<i32>} : memref<32x128xf32, #tpu.memory_space<vmem>>, vector<32x128xf32>,
    return
  }
  func.func @transform_0(%arg0: i32) -> (i32, i32, i32) {
    %c0_i32 = arith.constant 0 : i32
    %c0_i32_0 = arith.constant 0 : i32
    %c0_i32_1 = arith.constant 0 : i32
    return %c0_i32, %arg0, %c0_i32_0 : i32, i32, i32
  }
  func.func @transform_1(%arg0: i32) -> (i32, i32) {
    %c0_i32 = arith.constant 0 : i32
    %c0_i32_0 = arith.constant 0 : i32
    %c0_i32_1 = arith.constant 0 : i32
    return %c0_i32, %c0_i32_0 : i32, i32
  }
  func.func @transform_2(%arg0: i32) -> (i32, i32) {
    %c0_i32 = arith.constant 0 : i32
    %c0_i32_0 = arith.constant 0 : i32
    %c0_i32_1 = arith.constant 0 : i32
    return %c0_i32, %c0_i32_0 : i32, i32
  }
  func.func @transform_3(%arg0: i32) -> (i32, i32) {
    %c0_i32 = arith.constant 0 : i32
    %c0_i32_0 = arith.constant 0 : i32
    %c0_i32_1 = arith.constant 0 : i32
    return %c0_i32, %c0_i32_0 : i32, i32
  }
  func.func @transform_4(%arg0: i32) -> (i32, i32) {
    %c0_i32 = arith.constant 0 : i32
    %c0_i32_0 = arith.constant 0 : i32
    %c0_i32_1 = arith.constant 0 : i32
    return %c0_i32, %c0_i32_0 : i32, i32
  }
  func.func @transform_5(%arg0: i32) -> (i32, i32) {
    %c0_i32 = arith.constant 0 : i32
    %c0_i32_0 = arith.constant 0 : i32
    return %arg0, %c0_i32 : i32, i32
  }
}

</mosaic_0001>

<bundles_post_ra>
// kernel: tpu_custom_call.1
= control target key start
LH: loop header
LB: loop body
LE: loop exit
PB: predicated region body
PF: predicated region fallthrough
CT: control target
= control target key end

     0   :  { %10 = vsyncpa [#allocation3], 0  ;;  %s1622_s0 = inlined_call_operand.hbm [shape: f32[3,64,128], index: 0, kind: input, shape index: {}]   ;;  %s1623_s1 = inlined_call_operand.hbm [shape: f32[128,128], index: 1, kind: input, shape index: {}]   ;;  %s1624_s2 = inlined_call_operand.vmem [shape: f32[1,128], index: 2, kind: input, shape index: {}]   ;;  %s1625_s3 = inlined_call_operand.hbm [shape: f32[128,128], index: 3, kind: input, shape index: {}]   ;;  %s1626_s4 = inlined_call_operand.vmem [shape: f32[1,128], index: 4, kind: input, shape index: {}]   ;;  %s1627_s5 = inlined_call_operand.hbm [shape: f32[64,128], index: 5, kind: output, shape index: {}]  }
   0x1   :  { %12 = vsyncpa [#allocation3 + $0x1], 0 }
   0x2   :  { %13 = vsyncpa [#allocation6], 0 }
   0x3   :  { %14 = vsyncpa [#allocation4], 0 }
   0x4   :  { %16 = vsyncpa [#allocation4 + $0x1], 0  ;;  %s1343_s18 = smov 0   ;;  %s1345_s19 = smov 0  }
   0x5   :  { %s1347_s20 = smov 0   ;;  %s1349_s21 = smov 0  }
   0x6 LB: > { %s1364_s22 = sadd.s32 4294967295, %s1298_s21   ;;  %s817_s23 = sadd.s32 4294967294, %s1298_s21   ;;  %s1298_s21 = sphi %s1349_s21, %s1651_s21   ;;  %s1294_s20 = sphi %s1347_s20, %s1650_s20   ;;  %s1290_s19 = sphi %s1345_s19, %s1649_s19   ;;  %s1286_s18 = sphi %s1343_s18, %s1648_s18  }
   0x7   : > { %s1368_s24 = sadd.s32 1, %s1298_s21   ;;  %s29_s25 = sadd.s32 1, %s1294_s20 }
   0x8   : > { %s26_s26 = ssub.s32 %s1298_s21, %s1368_s24  ;;  %p36_p0 = scmp.ne.s32.totalorder %s1294_s20, %s1290_s19 }
   0x9   : > { %p27_p1 = scmp.eq.s32.totalorder %s26_s26, 0  ;;  %p37_p2 = scmp.eq.s32.totalorder %s1298_s21, 0 }
   0xa   : > { %p42_p3 = scmp.ne.s32.totalorder %s1290_s19, %s1286_s18  ;;  %p1628_p4 = scmp.eq.s32.totalorder %s1364_s22, 0 }
   0xb   : > { %s1380_s27 = scalar_select %p27_p1, %s1294_s20, %s29_s25  }
   0xc   : > { %p1382_p5 = por %p37_p2, %p36_p0  ;;  %p1388_p6 = por %p1628_p4, %p42_p3 }
   0xd   : > { %1633 = sst [smem:[#allocation15_spill]] %s1380_s27  ;;  %p150_p7 = scmp.eq.s32.totalorder %s1364_s22, 1 }
   0xe   : > { %s1634_s28 = scalar_select %p1382_p5, 1, 0 }
   0xf   : > { %s1635_s29 = scalar_select %p1388_p6, 1, 0 }
  0x10   : > { %p156_p8 = scmp.eq.s32.totalorder %s817_s23, 1  ;;  %p818_p9 = scmp.ge.s32.totalorder %s1298_s21, 1 }
  0x11   : > { %p163_p10 = scmp.lt.s32.totalorder %s1298_s21, 3  ;;  %p1395_p11 = por %p150_p7, %p36_p0 }
  0x12   : > { %p1399_p12 = por %p156_p8, %p42_p3  ;;  %s1300_s8 = smov [#allocation5]  }
  0x13   : > { %s1636_s30 = scalar_select %p1395_p11, 1, 0 }
  0x14   : > { %s1637_s6 = scalar_select %p1399_p12, 1, 0 }
  0x15   : > { %p1403_p13 = pnand %p818_p9, %p163_p10  ;;  %s175_s9 = sshll.u32 %s1300_s8, 4  ;;  %s176_s9 = int_to_ptr.vmem [resolvable:$true] %s175_s9 }
  0x16   : > { %s1301_s11 = smov [#allocation7]   ;;  %s1172_s15 = scalar_lea.hbm %s1623_s1, 2048 }
  0x17   : > { %s1638_s7 = scalar_select %p1403_p13, 1, 0 }
  0x18   : > { %p1080_p1 = pneg %p1403_p13  ;;  %s191_s12 = sshll.u32 %s1301_s11, 4  ;;  %s1415_s12 = int_to_ptr.vmem [resolvable:$true] %s191_s12 }
  0x19   : > { %p1173_p0 = scmp.ne.s32.totalorder %s1623_s1, %s1172_s15  ;;  %p1179_p9 = scmp.lt.u32.totalorder %s1172_s15, %s1623_s1 }
  0x1a   : > { %p1411_p2 = pnand %p1080_p1, %p1628_p4 }
  0x1c   : > { %p1174_p3 = pneg %p1411_p2 }
  0x1e   : > { %p1175_p7 = pnand %p1174_p3, %p1173_p0 }
  0x20   : > { %p1176_p8 = pneg %p1175_p7 }
  0x22   : > { %p1181_p10 = pnand %p1179_p9, %p1176_p8 }
  0x24   : > { %1184 = shalt.err (!%p1181_p10)
}
  0x25   : > { %s1185_s26 = scalar_lea.vmem %s176_s9, 2048  ;;  %p1193_p11 = scmp.lt.s32.totalorder %s176_s9, %s176_s9 }
  0x26   : > { %p1186_p1 = scmp.ne.s32.totalorder %s176_s9, %s1185_s26  ;;  %p1194_p6 = scmp.lt.s32.totalorder %s1185_s26, %s1185_s26 }
  0x28   : > { %p1188_p4 = pnand %p1186_p1, %p1174_p3  ;;  %p1195_p13 = por %p1194_p6, %p1193_p11 }
  0x2a   : > { %p1189_p12 = pneg %p1188_p4 }
  0x2c   : > { %p1196_p5 = pnand %p1195_p13, %p1189_p12 }
  0x2e   : > { %1199 = shalt.err (!%p1196_p5)
}
  0x2f   : > { %s1302_s8 = smov 128   ;;  %s1303_s11 = smov 8  }
  0x30   : > { %1083 = dma.hbm_to_vmem [thread:$0]  (!%p1411_p2), %s1623_s1, 2048, %s176_s9, [#allocation6], %s1302_s8, %s1302_s8, %s1303_s11  }
  0x31   : > { %s1200_s17 = scalar_lea.hbm %s1625_s3, 2048 }
  0x32   : > { %p1201_p4 = scmp.ne.s32.totalorder %s1625_s3, %s1200_s17  ;;  %p1207_p11 = scmp.lt.u32.totalorder %s1200_s17, %s1625_s3 }
  0x34   : > { %p1203_p5 = pnand %p1201_p4, %p1174_p3 }
  0x36   : > { %p1204_p6 = pneg %p1203_p5 }
  0x38   : > { %p1209_p12 = pnand %p1207_p11, %p1204_p6 }
  0x3a   : > { %1212 = shalt.err (!%p1209_p12)
}
  0x3b   : > { %s1213_s9 = scalar_lea.vmem %s1415_s12, 2048  ;;  %p1221_p8 = scmp.lt.s32.totalorder %s1415_s12, %s1415_s12 }
  0x3c   : > { %p1214_p13 = scmp.ne.s32.totalorder %s1415_s12, %s1213_s9  ;;  %p1222_p9 = scmp.lt.s32.totalorder %s1213_s9, %s1213_s9 }
  0x3e   : > { %p1216_p0 = pnand %p1214_p13, %p1174_p3  ;;  %p1223_p10 = por %p1222_p9, %p1221_p8 }
  0x40   : > { %p1217_p7 = pneg %p1216_p0 }
  0x42   : > { %p1224_p1 = pnand %p1223_p10, %p1217_p7 }
  0x44   : > { %1227 = shalt.err (!%p1224_p1)
}
  0x45   : > { %1086 = dma.hbm_to_vmem [thread:$0]  (!%p1411_p2), %s1625_s3, 2048, %s1415_s12, [#allocation6], %s1302_s8, %s1302_s8, %s1303_s11  }
  0x46   : > { %p821_p4 = scmp.ge.s32.totalorder %s1298_s21, 2 }
  0x48   : > { %204 = sbr.rel (%p821_p4) target bundleno = 95 (0x5f), region = 32 }
  0x4f   : > { %s208_s14 = sand.u32 1, %s1294_s20   ;;  %s837_s10 = sshll.u32 %s1298_s21, 9 }
  0x50   : > { %s1059_s15 = smul.u32 96, %s208_s14  ;;  %s1304_s16 = smov 1024  }
  0x51   : > { %p1640_p3 = scmp.ne.s32.totalorder %s1634_s28, 0  ;;  %s218_s17 = scalar_lea.hbm %s1622_s0, %s837_s10 }
  0x52   : > { %s212_s25 = scalar_lea.vmem [#allocation2], %s1059_s15  ;;  %s1305_s9 = smov 512  }
  0x53   : > { %1066 = sst [smem:[#allocation10]] (%p1640_p3), %s1304_s16  ;;  %s231_s26 = sshll.u32 %s212_s25, 4  ;;  %s232_s26 = int_to_ptr.vmem [resolvable:$true] %s231_s26 }
  0x54   : > { %s1065_s12 = scalar_select %p1640_p3, [#allocation0], [#allocation11] }
  0x55   : > { %1067 = sst [smem:[#allocation10 + $0x1]] (%p1640_p3), %s1305_s9  ;;  %s1306_s27 = smov 4  }
  0x56   : > { %s223_s23 = sld [smem:[%s1065_s12]]   ;;  %s1307_s13 = smov 128  }
  0x57   : > { %1068 = sst [smem:[#allocation10 + $0x2]] (%p1640_p3), %s1306_s27  ;;  %s1308_s16 = smov 8  }
  0x58   : > { %1069 = sst [smem:[#allocation10 + $0x3]] (%p1640_p3), %s1307_s13  ;;  %s209_s15 = scalar_lea.sflag [#allocation3], %s208_s14 }
  0x59   : > { %1070 = sst [smem:[#allocation10 + $0x4]] (%p1640_p3), %s1307_s13  ;;  %s1309_s8 = smov [#allocation9]  }
  0x5a   : > { %1071 = sst [smem:[#allocation10 + $0x5]] (%p1640_p3), %s1308_s16 }
  0x5c   : > { %s824_s10 = sshll.u32 %s223_s23, 26 }
  0x5d   : > { %s825_s12 = sadd.s32 134217728, %s824_s10 }
  0x5e   : > { %1072 = dma.general (%p1640_p3), %s218_s17, 1536, %s232_s26, %s209_s15, %s1309_s8, [#allocation10], %s825_s12, 0  }
  0x5f PF: > { %p1641_p2 = scmp.ne.s32.totalorder %s1638_s7, 0 }
  0x60   : > { %s1491_s11 = sand.u32 (!%p1641_p2), 1, %s1290_s19   ;;  %p1642_p5 = scmp.ne.s32.totalorder (!%p1641_p2), %s1635_s29, 0 }
  0x61   : > { %256 = sbr.rel (%p1641_p2) target bundleno = 688 (0x2b0), region = 40  ;;  %s259_s9 = scalar_lea.sflag (!%p1641_p2), [#allocation3], %s1491_s11 }
  0x62   : > { %s1060_s25 = smul.u32 (!%p1641_p2), 96, %s1491_s11 }
  0x64   : > { %s1495_s27 = scalar_lea.vmem (!%p1641_p2), [#allocation2], %s1060_s25 }
  0x68   : > { %1273 = dma.done.wait (%p1642_p5), %s259_s9, 1536  }
  0x69   : > { %1275 = vsyncadd (%p1642_p5), %s259_s9, 4294965760  ;;  %p1643_p6 = scmp.eq.s32.totalorder %s1364_s22, 0 }
  0x6b   : > { %1277 = dma.done.wait (%p1643_p6), [#allocation6], 4096   ;;  %p1644_p11 = pmov %p1643_p6 }
  0x6c   : > { %v311_v0 = vld [vmem:[#allocation5] sm:$0xff]  ;;  %v312_v1 = vld [vmem:[#allocation5 + $0x8] sm:$0xff]  ;;  %v313_v2 = vld [vmem:[#allocation5 + $0x10] sm:$0xff]  ;;  %s829_s17 = sshll.u32 %s1491_s11, 5  ;;  %s838_s26 = sshll.u32 %s1364_s22, 9 }
  0x6d   : > { %1279 = vsyncadd (%p1644_p11), [#allocation6], 4294963200  ;;  %v995_v3 = vpack.c.bf16 %v312_v1, %v311_v0  ;;  %v314_v4 = vld [vmem:[#allocation5 + $0x18] sm:$0xff]  ;;  %v1506_v6 = vld [vmem:[%s1495_s27] sm:$0xff]  ;;  %s296_s23 = scalar_lea.vmem [#allocation8], %s829_s17  ;;  %s1576_s12 = scalar_lea.hbm %s1627_s5, %s838_s26 }
  0x6e   : > { %v999_v5 = vpack.c.bf16 %v314_v4, %v313_v2  ;;  %v315_v7 = vld [vmem:[#allocation5 + $0x20] sm:$0xff]  ;;  %v316_v8 = vld [vmem:[#allocation5 + $0x28] sm:$0xff]  ;;  %927 = vmatprep.mubr.f32.mxu0 %v1506_v6  ;;  %v329_v13 = vld [vmem:[#allocation7 + $0x10] sm:$0xff]  ;;  %s725_s13 = sshll.u32 %s296_s23, 4  ;;  %s712_s15 = scalar_lea.sflag [#allocation4], %s1491_s11  ;;  %s1578_s13 = int_to_ptr.vmem [resolvable:$true] %s725_s13 }
  0x6f   : > { %996 = vmatprep.subr.bf16.mxu0 %v995_v3  ;;  %v1003_v9 = vpack.c.bf16 %v316_v8, %v315_v7  ;;  %v327_v10 = vld [vmem:[#allocation7] sm:$0xff]  ;;  %v328_v11 = vld [vmem:[#allocation7 + $0x8] sm:$0xff]  ;;  %v330_v14 = vld [vmem:[#allocation7 + $0x18] sm:$0xff]  ;;  %s1228_s22 = scalar_lea.vmem %s1578_s13, 512  ;;  %p1645_p13 = scmp.ne.s32.totalorder %s1636_s30, 0 }
  0x70   : > { %998 = vmatpush3.bf16.xpose.msra.mxu0 %v995_v3  ;;  %v1027_v12 = vpack.c.bf16 %v328_v11, %v327_v10  ;;  %v1031_v15 = vpack.c.bf16 %v330_v14, %v329_v13  ;;  %v317_v16 = vld [vmem:[#allocation5 + $0x30] sm:$0xff]  ;;  %v318_v17 = vld [vmem:[#allocation5 + $0x38] sm:$0xff]  ;;  %v331_v18 = vld [vmem:[#allocation7 + $0x20] sm:$0xff]  ;;  %p1229_p12 = scmp.ne.s32.totalorder %s1578_s13, %s1228_s22  ;;  %s1310_s8 = smov [#allocation8]  }
  0x71   : > { %1000 = vmatprep.subr.bf16.mxu0 %v999_v5  ;;  %v332_v19 = vld [vmem:[#allocation7 + $0x28] sm:$0xff]  ;;  %v1007_v20 = vpack.c.bf16 %v318_v17, %v317_v16  ;;  %v319_v22 = vld [vmem:[#allocation5 + $0x40] sm:$0xff]  ;;  %v333_v24 = vld [vmem:[#allocation7 + $0x30] sm:$0xff]  ;;  %s1232_s25 = sshll.u32 %s1310_s8, 4  ;;  %s1233_s25 = int_to_ptr.vmem [resolvable:$false] %s1232_s25 }
  0x72   : > { %1028 = vmatprep.subr.bf16.mxu1 %v1027_v12  ;;  %v1035_v21 = vpack.c.bf16 %v332_v19, %v331_v18  ;;  %v320_v23 = vld [vmem:[#allocation5 + $0x48] sm:$0xff]  ;;  %v334_v25 = vld [vmem:[#allocation7 + $0x38] sm:$0xff]  ;;  %v321_v28 = vld [vmem:[#allocation5 + $0x50] sm:$0xff]  ;;  %p1230_p0 = pnand %p1229_p12, %p1645_p13  ;;  %s1234_s9 = scalar_lea.vmem %s1233_s25, 1024 }
  0x73   : > { %1030 = vmatpush3.bf16.xpose.msra.mxu1 %v1027_v12  ;;  %v1011_v26 = vpack.c.bf16 %v320_v23, %v319_v22  ;;  %v1039_v27 = vpack.c.bf16 %v334_v25, %v333_v24  ;;  %v322_v29 = vld [vmem:[#allocation5 + $0x58] sm:$0xff]  ;;  %v335_v30 = vld [vmem:[#allocation7 + $0x40] sm:$0xff]  ;;  %v336_v31 = vld [vmem:[#allocation7 + $0x48] sm:$0xff]  ;;  %p1235_p8 = scmp.lt.s32.totalorder %s1578_s13, %s1233_s25  ;;  %p1236_p9 = scmp.lt.s32.totalorder %s1234_s9, %s1228_s22 }
  0x74   : > { %1032 = vmatprep.subr.bf16.mxu1 %v1031_v15  ;;  %v1015_v32 = vpack.c.bf16 %v322_v29, %v321_v28  ;;  %v1043_v33 = vpack.c.bf16 %v336_v31, %v335_v30  ;;  %v323_v34 = vld [vmem:[#allocation5 + $0x60] sm:$0xff]  ;;  %v324_v35 = vld [vmem:[#allocation5 + $0x68] sm:$0xff]  ;;  %v337_v36 = vld [vmem:[#allocation7 + $0x50] sm:$0xff]  ;;  %p1231_p7 = pneg %p1230_p0 }
  0x75   : > { %v338_v37 = vld [vmem:[#allocation7 + $0x58] sm:$0xff]  ;;  %v1019_v38 = vpack.c.bf16 %v324_v35, %v323_v34  ;;  %v325_v40 = vld [vmem:[#allocation5 + $0x70] sm:$0xff]  ;;  %v339_v42 = vld [vmem:[#allocation7 + $0x60] sm:$0xff]  ;;  %p1237_p10 = por %p1236_p9, %p1235_p8 }
  0x76   : > { %v1047_v39 = vpack.c.bf16 %v338_v37, %v337_v36  ;;  %v326_v41 = vld [vmem:[#allocation5 + $0x78] sm:$0xff]  ;;  %v340_v43 = vld [vmem:[#allocation7 + $0x68] sm:$0xff]  ;;  %v341_v46 = vld [vmem:[#allocation7 + $0x70] sm:$0xff] }
  0x77   : > { %v1023_v44 = vpack.c.bf16 %v326_v41, %v325_v40  ;;  %v1051_v45 = vpack.c.bf16 %v340_v43, %v339_v42  ;;  %v342_v47 = vld [vmem:[#allocation7 + $0x78] sm:$0xff]  ;;  %v1510_v49 = vld [vmem:[%s1495_s27 + $0x8] sm:$0xff]  ;;  %v1513_v50 = vld [vmem:[%s1495_s27 + $0x10] sm:$0xff]  ;;  %p1238_p1 = pnand %p1237_p10, %p1231_p7 }
  0x78   : > { %1002 = vmatpush3.bf16.xpose.msra.mxu0 %v999_v5  ;;  %v1055_v48 = vpack.c.bf16 %v342_v47, %v341_v46  ;;  %v1518_v51 = vld [vmem:[%s1495_s27 + $0x18] sm:$0xff]  ;;  %v1521_v52 = vld [vmem:[%s1495_s27 + $0x20] sm:$0xff]  ;;  %v1526_v53 = vld [vmem:[%s1495_s27 + $0x28] sm:$0xff] }
  0x79   : > { %1004 = vmatprep.subr.bf16.mxu0 %v1003_v9  ;;  %v1529_v54 = vld [vmem:[%s1495_s27 + $0x30] sm:$0xff]  ;;  %v1534_v55 = vld [vmem:[%s1495_s27 + $0x38] sm:$0xff]  ;;  %v1537_v56 = vld [vmem:[%s1495_s27 + $0x40] sm:$0xff] }
  0x7a   : > { %v1542_v57 = vld [vmem:[%s1495_s27 + $0x48] sm:$0xff]  ;;  %v1545_v58 = vld [vmem:[%s1495_s27 + $0x50] sm:$0xff]  ;;  %v1550_v59 = vld [vmem:[%s1495_s27 + $0x58] sm:$0xff] }
  0x7b   : > { %1034 = vmatpush3.bf16.xpose.msra.mxu1 %v1031_v15  ;;  %v830_v60 = vld [vmem:[%s1624_s2] ss:$0 sm:$0xff] }
  0x7c   : > { %1036 = vmatprep.subr.bf16.mxu1 %v1035_v21 }
  0x80   : > { %1006 = vmatpush3.bf16.xpose.msra.mxu0 %v1003_v9 }
  0x81   : > { %1008 = vmatprep.subr.bf16.mxu0 %v1007_v20 }
  0x83   : > { %1038 = vmatpush3.bf16.xpose.msra.mxu1 %v1035_v21 }
  0x84   : > { %1040 = vmatprep.subr.bf16.mxu1 %v1039_v27 }
  0x88   : > { %1010 = vmatpush3.bf16.xpose.msra.mxu0 %v1007_v20 }
  0x89   : > { %1012 = vmatprep.subr.bf16.mxu0 %v1011_v26 }
  0x8b   : > { %1042 = vmatpush3.bf16.xpose.msra.mxu1 %v1039_v27 }
  0x8c   : > { %1044 = vmatprep.subr.bf16.mxu1 %v1043_v33 }
  0x90   : > { %1014 = vmatpush3.bf16.xpose.msra.mxu0 %v1011_v26 }
  0x91   : > { %1016 = vmatprep.subr.bf16.mxu0 %v1015_v32 }
  0x93   : > { %1046 = vmatpush3.bf16.xpose.msra.mxu1 %v1043_v33 }
  0x94   : > { %1048 = vmatprep.subr.bf16.mxu1 %v1047_v39 }
  0x98   : > { %1018 = vmatpush3.bf16.xpose.msra.mxu0 %v1015_v32 }
  0x99   : > { %1020 = vmatprep.subr.bf16.mxu0 %v1019_v38 }
  0x9b   : > { %1050 = vmatpush3.bf16.xpose.msra.mxu1 %v1047_v39 }
  0x9c   : > { %1052 = vmatprep.subr.bf16.mxu1 %v1051_v45 }
  0xa0   : > { %1022 = vmatpush3.bf16.xpose.msra.mxu0 %v1019_v38  ;;  %v831_v38 = vld [vmem:[%s1626_s4] ss:$0 sm:$0xff] }
  0xa1   : > { %1024 = vmatprep.subr.bf16.mxu0 %v1023_v44 }
  0xa3   : > { %1054 = vmatpush3.bf16.xpose.msra.mxu1 %v1051_v45 }
  0xa4   : > { %1056 = vmatprep.subr.bf16.mxu1 %v1055_v48 }
  0xa8   : > { %1026 = vmatpush3.bf16.xpose.msra.mxu0 %v1023_v44 }
  0xab   : > { %1058 = vmatpush3.bf16.xpose.msra.mxu1 %v1055_v48 }
  0xaf   : > { %928 = vmatmul.mubr.f32.vlgmr.msra.gmra.mrb[0].mxu0 %v1510_v49 }
  0xb0   : > { %930 = vmatprep.mubr.f32.mxu0 %v1513_v50 }
  0xb3   : > { %931 = vmatmul.mubr.f32.gmra.mrb[2].mxu0 %v1518_v51 }
  0xb4   : > { %933 = vmatprep.mubr.f32.mxu0 %v1521_v52 }
  0xb7   : > { %934 = vmatmul.mubr.f32.gmra.mrb[4].mxu0 %v1526_v53 }
  0xb8   : > { %936 = vmatprep.mubr.f32.mxu0 %v1529_v54 }
  0xbb   : > { %937 = vmatmul.mubr.f32.gmra.mrb[6].mxu0 %v1534_v55 }
  0xbc   : > { %939 = vmatprep.mubr.f32.mxu0 %v1537_v56 }
  0xbf   : > { %940 = vmatmul.mubr.f32.gmra.mrb[8].mxu0 %v1542_v57 }
  0xc0   : > { %942 = vmatprep.mubr.f32.mxu0 %v1545_v58 }
  0xc3   : > { %943 = vmatmul.mubr.f32.gmra.mrb[10].mxu0 %v1550_v59 }
 0x182   : > { %v929_v61 = vpop.f32.mrb[0].mxu0 }
 0x183   : > { %v422_v62 = vadd.f32 %v929_v61, %v830_v60  ;;  %v416_v63 = vpop.f32.mrb[1].mxu0 }
 0x184   : > { %v417_v0 = vadd.f32 %v830_v60, %v416_v63 }
 0x185   : > { %v476_v3 = vmax.f32 %v422_v62, 0.0 }
 0x186   : > { %v932_v1 = vpop.f32.mrb[2].mxu0  ;;  %v475_v2 = vmax.f32 %v417_v0, 0.0 }
 0x187   : > { %v432_v4 = vadd.f32 %v932_v1, %v830_v60  ;;  %v426_v5 = vpop.f32.mrb[3].mxu0 }
 0x188   : > { %v427_v7 = vadd.f32 %v830_v60, %v426_v5  ;;  %977 = vmatprep.mubr.f32.mxu1 %v475_v2 }
 0x189   : > { %978 = vmatmul.mubr.f32.vlgmr.msra.gmra.mrb[0].mxu1 %v476_v3  ;;  %v478_v10 = vmax.f32 %v432_v4, 0.0 }
 0x18a   : > { %v477_v8 = vmax.f32 %v427_v7, 0.0  ;;  %v935_v9 = vpop.f32.mrb[4].mxu0 }
 0x18b   : > { %v442_v11 = vadd.f32 %v935_v9, %v830_v60  ;;  %v436_v12 = vpop.f32.mrb[5].mxu0 }
 0x18c   : > { %v437_v13 = vadd.f32 %v830_v60, %v436_v12  ;;  %980 = vmatprep.mubr.f32.mxu1 %v477_v8 }
 0x18d   : > { %981 = vmatmul.mubr.f32.gmra.mrb[2].mxu1 %v478_v10  ;;  %v480_v16 = vmax.f32 %v442_v11, 0.0 }
 0x18e   : > { %v479_v14 = vmax.f32 %v437_v13, 0.0  ;;  %v938_v15 = vpop.f32.mrb[6].mxu0 }
 0x18f   : > { %v452_v17 = vadd.f32 %v938_v15, %v830_v60  ;;  %v446_v18 = vpop.f32.mrb[7].mxu0 }
 0x190   : > { %v447_v19 = vadd.f32 %v830_v60, %v446_v18  ;;  %983 = vmatprep.mubr.f32.mxu1 %v479_v14 }
 0x191   : > { %984 = vmatmul.mubr.f32.gmra.mrb[4].mxu1 %v480_v16  ;;  %v482_v22 = vmax.f32 %v452_v17, 0.0 }
 0x192   : > { %v481_v20 = vmax.f32 %v447_v19, 0.0  ;;  %v941_v21 = vpop.f32.mrb[8].mxu0 }
 0x193   : > { %v462_v23 = vadd.f32 %v941_v21, %v830_v60  ;;  %v456_v24 = vpop.f32.mrb[9].mxu0 }
 0x194   : > { %v457_v25 = vadd.f32 %v830_v60, %v456_v24  ;;  %986 = vmatprep.mubr.f32.mxu1 %v481_v20 }
 0x195   : > { %987 = vmatmul.mubr.f32.gmra.mrb[6].mxu1 %v482_v22  ;;  %v484_v28 = vmax.f32 %v462_v23, 0.0 }
 0x196   : > { %v483_v26 = vmax.f32 %v457_v25, 0.0  ;;  %v944_v27 = vpop.f32.mrb[10].mxu0 }
 0x197   : > { %v472_v29 = vadd.f32 %v944_v27, %v830_v60  ;;  %v466_v30 = vpop.f32.mrb[11].mxu0 }
 0x198   : > { %v467_v31 = vadd.f32 %v830_v60, %v466_v30  ;;  %989 = vmatprep.mubr.f32.mxu1 %v483_v26 }
 0x199   : > { %990 = vmatmul.mubr.f32.gmra.mrb[8].mxu1 %v484_v28  ;;  %v486_v33 = vmax.f32 %v472_v29, 0.0 }
 0x19a   : > { %v485_v32 = vmax.f32 %v467_v31, 0.0 }
 0x19c   : > { %992 = vmatprep.mubr.f32.mxu1 %v485_v32 }
 0x19d   : > { %993 = vmatmul.mubr.f32.gmra.mrb[10].mxu1 %v486_v33 }
 0x25c   : > { %v979_v34 = vpop.f32.mrb[0].mxu1 }
 0x25d   : > { %v560_v35 = vpop.f32.mrb[1].mxu1  ;;  %v566_v40 = vadd.f32 %v979_v34, %v831_v38 }
 0x25e   : > { %v561_v43 = vadd.f32 %v831_v38, %v560_v35 }
 0x260   : > { %v982_v36 = vpop.f32.mrb[2].mxu1 }
 0x261   : > { %v570_v37 = vpop.f32.mrb[3].mxu1  ;;  %v576_v48 = vadd.f32 %v982_v36, %v831_v38 }
 0x262   : > { %v571_v62 = vadd.f32 %v831_v38, %v570_v37 }
 0x264   : > { %v985_v39 = vpop.f32.mrb[4].mxu1 }
 0x265   : > { %v586_v41 = vadd.f32 %v985_v39, %v831_v38  ;;  %v580_v42 = vpop.f32.mrb[5].mxu1 }
 0x266   : > { %v581_v44 = vadd.f32 %v831_v38, %v580_v42 }
 0x267   : > { %v621_v45 = vmax.f32 %v566_v40, %v586_v41 }
 0x268   : > { %v619_v46 = vmax.f32 %v561_v43, %v581_v44  ;;  %v988_v47 = vpop.f32.mrb[6].mxu1 }
 0x269   : > { %v596_v60 = vadd.f32 %v988_v47, %v831_v38  ;;  %v590_v61 = vpop.f32.mrb[7].mxu1 }
 0x26a   : > { %v591_v63 = vadd.f32 %v831_v38, %v590_v61 }
 0x26b   : > { %v625_v0 = vmax.f32 %v576_v48, %v596_v60 }
 0x26c   : > { %v623_v1 = vmax.f32 %v571_v62, %v591_v63  ;;  %v991_v2 = vpop.f32.mrb[8].mxu1 }
 0x26d   : > { %v606_v3 = vadd.f32 %v991_v2, %v831_v38  ;;  %v600_v4 = vpop.f32.mrb[9].mxu1 }
 0x26e   : > { %v601_v5 = vadd.f32 %v831_v38, %v600_v4 }
 0x26f   : > { %v622_v7 = vmax.f32 %v621_v45, %v606_v3 }
 0x270   : > { %v620_v8 = vmax.f32 %v619_v46, %v601_v5  ;;  %v994_v9 = vpop.f32.mrb[10].mxu1 }
 0x271   : > { %v628_v10 = vsub.f32 %v566_v40, %v622_v7  ;;  %v632_v11 = vsub.f32 %v586_v41, %v622_v7  ;;  %v636_v12 = vsub.f32 %v606_v3, %v622_v7  ;;  %v616_v13 = vadd.f32 %v994_v9, %v831_v38  ;;  %v610_v14 = vpop.f32.mrb[11].mxu1 }
 0x272   : > { %v627_v15 = vsub.f32 %v561_v43, %v620_v8  ;;  %v631_v16 = vsub.f32 %v581_v44, %v620_v8  ;;  %v635_v17 = vsub.f32 %v601_v5, %v620_v8  ;;  %v611_v18 = vadd.f32 %v831_v38, %v610_v14 }
 0x273   : > { %v641_v19 = vmul.f32 1.442695, %v628_v10  ;;  %v649_v20 = vmul.f32 1.442695, %v632_v11  ;;  %v657_v21 = vmul.f32 1.442695, %v636_v12  ;;  %v626_v22 = vmax.f32 %v625_v0, %v616_v13 }
 0x274   : > { %v639_v23 = vmul.f32 1.442695, %v627_v15  ;;  %v647_v24 = vmul.f32 1.442695, %v631_v16  ;;  %v655_v25 = vmul.f32 1.442695, %v635_v17  ;;  %v624_v26 = vmax.f32 %v623_v1, %v611_v18 }
 0x275   : > { %1140 = vpow2.f32 %v641_v19  ;;  %v630_v27 = vsub.f32 %v576_v48, %v626_v22  ;;  %v634_v28 = vsub.f32 %v596_v60, %v626_v22  ;;  %v638_v29 = vsub.f32 %v616_v13, %v626_v22 }
 0x276   : > { %1142 = vpow2.f32 %v649_v20  ;;  %v629_v30 = vsub.f32 %v571_v62, %v624_v26  ;;  %v633_v31 = vsub.f32 %v591_v63, %v624_v26  ;;  %v637_v32 = vsub.f32 %v611_v18, %v624_v26 }
 0x277   : > { %1144 = vpow2.f32 %v657_v21  ;;  %v645_v33 = vmul.f32 1.442695, %v630_v27  ;;  %v653_v34 = vmul.f32 1.442695, %v634_v28  ;;  %v661_v35 = vmul.f32 1.442695, %v638_v29 }
 0x278   : > { %1146 = vpow2.f32 %v639_v23  ;;  %v643_v36 = vmul.f32 1.442695, %v629_v30  ;;  %v651_v37 = vmul.f32 1.442695, %v633_v31  ;;  %v659_v38 = vmul.f32 1.442695, %v637_v32 }
 0x279   : > { %1148 = vpow2.f32 %v647_v24 }
 0x27a   : > { %1150 = vpow2.f32 %v655_v25 }
 0x27b   : > { %1152 = vpow2.f32 %v645_v33 }
 0x27c   : > { %1154 = vpow2.f32 %v653_v34 }
 0x27d   : > { %1156 = vpow2.f32 %v661_v35 }
 0x27e   : > { %1158 = vpow2.f32 %v643_v36 }
 0x27f   : > { %v1141_v39 = vpop.eup %1140  ;;  %1160 = vpow2.f32 %v651_v37 }
 0x280   : > { %v1143_v40 = vpop.eup %1142  ;;  %1162 = vpow2.f32 %v659_v38 }
 0x281   : > { %v1145_v41 = vpop.eup %1144  ;;  %v665_v42 = vadd.f32 %v1143_v40, %v1141_v39 }
 0x282   : > { %v1147_v43 = vpop.eup %1146 }
 0x283   : > { %v1149_v44 = vpop.eup %1148  ;;  %v666_v45 = vadd.f32 %v1145_v41, %v665_v42 }
 0x284   : > { %v1151_v46 = vpop.eup %1150  ;;  %v663_v47 = vadd.f32 %v1149_v44, %v1147_v43 }
 0x285   : > { %v1153_v48 = vpop.eup %1152  ;;  %1164 = vrcp.f32 %v666_v45 }
 0x286   : > { %v1155_v60 = vpop.eup %1154  ;;  %v664_v61 = vadd.f32 %v1151_v46, %v663_v47 }
 0x287   : > { %v1157_v62 = vpop.eup %1156  ;;  %v669_v63 = vadd.f32 %v1155_v60, %v1153_v48 }
 0x288   : > { %v1159_v0 = vpop.eup %1158  ;;  %1166 = vrcp.f32 %v664_v61 }
 0x289   : > { %v1161_v1 = vpop.eup %1160  ;;  %v670_v2 = vadd.f32 %v1157_v62, %v669_v63 }
 0x28a   : > { %v667_v3 = vadd.f32 %v1161_v1, %v1159_v0  ;;  %v1163_v4 = vpop.eup %1162 }
 0x28b   : > { %1168 = vrcp.f32 %v670_v2 }
 0x28c   : > { %v668_v5 = vadd.f32 %v1163_v4, %v667_v3 }
 0x28e   : > { %1170 = vrcp.f32 %v668_v5 }
 0x28f   : > { %v1165_v7 = vpop.eup %1164 }
 0x290   : > { %v676_v8 = vmul.f32 %v1165_v7, %v1141_v39  ;;  %v680_v9 = vmul.f32 %v1165_v7, %v1143_v40  ;;  %v684_v10 = vmul.f32 %v1165_v7, %v1145_v41 }
 0x292   : > { %v1167_v11 = vpop.eup %1166  ;;  %v688_v12 = vmul.f32 %v676_v8, %v1510_v49  ;;  %v692_v13 = vmul.f32 %v680_v9, %v1526_v53  ;;  %v696_v17 = vmul.f32 %v684_v10, %v1542_v57 }
 0x293   : > { %v675_v14 = vmul.f32 %v1167_v11, %v1147_v43  ;;  %v679_v15 = vmul.f32 %v1167_v11, %v1149_v44  ;;  %v683_v16 = vmul.f32 %v1167_v11, %v1151_v46 }
 0x294   : > { %v701_v18 = vadd.f32 %v692_v13, %v688_v12 }
 0x295   : > { %v1169_v19 = vpop.eup %1168  ;;  %v687_v20 = vmul.f32 %v675_v14, %v1506_v6  ;;  %v691_v21 = vmul.f32 %v679_v15, %v1521_v52  ;;  %v695_v26 = vmul.f32 %v683_v16, %v1537_v56 }
 0x296   : > { %v702_v22 = vadd.f32 %v701_v18, %v696_v17  ;;  %v678_v23 = vmul.f32 %v1169_v19, %v1153_v48  ;;  %v682_v24 = vmul.f32 %v1169_v19, %v1155_v60  ;;  %v686_v25 = vmul.f32 %v1169_v19, %v1157_v62 }
 0x297   : > { %v699_v49 = vadd.f32 %v691_v21, %v687_v20 }
 0x298   : > { %v1171_v53 = vpop.eup %1170  ;;  %708 = vst [vmem:[%s296_s23 + $0x8] sm:$0xff] %v702_v22  ;;  %v690_v27 = vmul.f32 %v678_v23, %v1518_v51  ;;  %v694_v57 = vmul.f32 %v682_v24, %v1534_v55  ;;  %v698_v52 = vmul.f32 %v686_v25, %v1550_v59 }
 0x299   : > { %v700_v28 = vadd.f32 %v699_v49, %v695_v26  ;;  %v677_v29 = vmul.f32 %v1171_v53, %v1159_v0  ;;  %v681_v6 = vmul.f32 %v1171_v53, %v1161_v1  ;;  %v685_v30 = vmul.f32 %v1171_v53, %v1163_v4 }
 0x29a   : > { %v705_v31 = vadd.f32 %v694_v57, %v690_v27 }
 0x29b   : > { %707 = vst [vmem:[%s296_s23] sm:$0xff] %v700_v28  ;;  %v689_v56 = vmul.f32 %v677_v29, %v1513_v50  ;;  %v693_v32 = vmul.f32 %v681_v6, %v1529_v54  ;;  %v697_v51 = vmul.f32 %v685_v30, %v1545_v58 }
 0x29c   : > { %v706_v33 = vadd.f32 %v705_v31, %v698_v52 }
 0x29d   : > { %v703_v55 = vadd.f32 %v693_v32, %v689_v56 }
 0x29e   : > { %710 = vst [vmem:[%s296_s23 + $0x18] sm:$0xff] %v706_v33 }
 0x29f   : > { %v704_v50 = vadd.f32 %v703_v55, %v697_v51 }
 0x2a1   : > { %709 = vst [vmem:[%s296_s23 + $0x10] sm:$0xff] %v704_v50 }
 0x2a2   : > { %1241 = shalt.err (!%p1238_p1)
}
 0x2a3   : > { %s1242_s27 = scalar_lea.hbm %s1576_s12, 512  ;;  %s1246_s7 = scalar_lea.hbm %s1627_s5, 1024 }
 0x2a4   : > { %p1243_p3 = scmp.ne.s32.totalorder %s1576_s12, %s1242_s27  ;;  %p1247_p6 = scmp.lt.u32.totalorder %s1576_s12, %s1627_s5 }
 0x2a5   : > { %p1248_p11 = scmp.lt.u32.totalorder %s1246_s7, %s1242_s27  ;;  %p1250_p0 = scmp.lt.u32.totalorder %s1242_s27, %s1576_s12 }
 0x2a6   : > { %p1244_p2 = pnand %p1243_p3, %p1645_p13 }
 0x2a7   : > { %p1249_p12 = por %p1248_p11, %p1247_p6 }
 0x2a8   : > { %p1245_p5 = pneg %p1244_p2 }
 0x2a9   : > { %p1251_p7 = por %p1250_p0, %p1249_p12 }
 0x2ab   : > { %p1252_p8 = pnand %p1251_p7, %p1245_p5 }
 0x2ad   : > { %1255 = shalt.err (!%p1252_p8)
}
 0x2ae   : > { %s1311_s23 = smov 128   ;;  %s1312_s26 = smov 8  }
 0x2af   : > { %1078 = dma.vmem_to_hbm [thread:$0]  (%p1645_p13), %s1578_s13, 512, %s1576_s12, %s712_s15, %s1311_s23, %s1311_s23, %s1312_s26  }
 0x2b0 PF: > { %s740_s16 = sand.u32 1, %s1286_s18   ;;  %p1646_p9 = scmp.ne.s32.totalorder %s1637_s6, 0 }
 0x2b1   : > { %s741_s10 = scalar_lea.sflag [#allocation4], %s740_s16 }
 0x2b2   : > { %p1088_p10 = pnand %p821_p4, %p1646_p9 }
 0x2b4   : > { %1281 = dma.done.wait (!%p1088_p10), %s741_s10, 512  }
 0x2b5   : > { %1283 = vsyncadd (!%p1088_p10), %s741_s10, 4294966784  ;;  %s1647_s22 = sld [smem:[#allocation15_spill]]  ;;  %p19_p1 = scmp.ge.s32.totalorder %s1368_s24, 4  }
 0x2b6   : > { %s1648_s18 = smov %s1290_s19  ;;  %s1649_s19 = smov %s1294_s20 }
 0x2b7   : > { %s1651_s21 = smov %s1368_s24  ;;  %21 = sbr.rel (!%p19_p1) target bundleno = 6 (0x6), region = 98 }
 0x2bb   : > { %s1650_s20 = smov %s1647_s22 }
 0x2be   :  { %746 = vsyncpa [#allocation3], 1 }
 0x2bf   :  { %748 = vsyncpa [#allocation3 + $0x1], 1 }
 0x2c0   :  { %749 = vsyncpa [#allocation6], 1 }
 0x2c1   :  { %750 = vsyncpa [#allocation4], 1 }
 0x2c2   :  { %752 = vsyncpa [#allocation4 + $0x1], 1 }

</bundles_post_ra>
